<compile_context>
chip_gen: v7x
topology: tpu7x:2x2x1
jax: 0.10.0
libtpu: 0.0.40
codegen_flags: <defaults>
</compile_context>

<pallas_src>
import jax
import jax.numpy as jnp
from jax import lax
from jax.experimental import pallas as pl
from jax.experimental.pallas import tpu as pltpu


def _attention_kernel(hidden_ref, enc_ref, w_h_ref, w_e_ref, b_ref, v_ref,
                      out_ref):
    # hidden_ref : (1, H)    decoder hidden state
    # enc_ref    : (S, 2H)   encoder outputs
    # w_h_ref    : (H, H)    attn weight rows acting on `hidden` (x @ W layout)
    # w_e_ref    : (2H, H)   attn weight rows acting on `encoder_output`
    # b_ref      : (1, H)    attn bias
    # v_ref      : (1, H)    v weight as a row vector
    # out_ref    : (1, S)    softmax over the S (lane) axis

    # Hidden projection computed once: (1,H) @ (H,H) + bias -> (1,H)
    h_proj = (
        jnp.dot(hidden_ref[...], w_h_ref[...],
                preferred_element_type=jnp.float32)
        + b_ref[...]
    )

    # Encoder projection + broadcast add of h_proj, tanh on VPU/EUP -> (S, H)
    energy = jnp.tanh(
        jnp.dot(enc_ref[...], w_e_ref[...],
                preferred_element_type=jnp.float32)
        + h_proj
    )

    # Lane-dense scores (1, S): contract H between v (1,H) and energy (S,H)
    # (same pattern as q @ k^T in attention kernels).
    scores = lax.dot_general(
        v_ref[...], energy,
        dimension_numbers=(((1,), (1,)), ((), ())),
        preferred_element_type=jnp.float32,
    )  # (1, S)

    # Softmax along the lane axis (cheap lane reductions via XLU).
    m = jnp.max(scores, axis=-1, keepdims=True)
    e = jnp.exp(scores - m)
    denom = jnp.sum(e, axis=-1, keepdims=True)
    out_ref[...] = (e * pl.reciprocal(denom, approx=True)).astype(out_ref.dtype)


def attention_forward(hidden, encoder_output, attn_w, attn_b, v_w):
    """Pallas wrapper.

    hidden         : (1, H)  float32
    encoder_output : (S, 2H) float32
    attn_w         : (3H, H) float32   (= torch attn.weight.T, x @ W layout)
    attn_b         : (H,)    float32
    v_w            : (H, 1)  float32   (= torch v.weight.T)
    returns        : (S,)    float32   softmax attention weights
    """
    S = encoder_output.shape[0]
    H = hidden.shape[1]

    # One-time parameter-sized reshapes/splits (outside the hot path).
    w_h = attn_w[:H, :]            # (H, H)   acts on hidden
    w_e = attn_w[H:, :]            # (2H, H)  acts on encoder_output
    b2d = attn_b.reshape(1, H)     # (1, H)
    v_row = v_w.reshape(1, H)      # (1, H)   (v_w is (H,1); reshape == transpose)

    out = pl.pallas_call(
        _attention_kernel,
        out_shape=jax.ShapeDtypeStruct((1, S), jnp.float32),
        in_specs=[
            pl.BlockSpec(memory_space=pltpu.VMEM),  # hidden         (1, H)
            pl.BlockSpec(memory_space=pltpu.VMEM),  # encoder_output (S, 2H)
            pl.BlockSpec(memory_space=pltpu.VMEM),  # w_h            (H, H)
            pl.BlockSpec(memory_space=pltpu.VMEM),  # w_e            (2H, H)
            pl.BlockSpec(memory_space=pltpu.VMEM),  # attn_b         (1, H)
            pl.BlockSpec(memory_space=pltpu.VMEM),  # v_row          (1, H)
        ],
        out_specs=pl.BlockSpec(memory_space=pltpu.VMEM),
    )(hidden, encoder_output, w_h, w_e, b2d, v_row)

    return out[0]  # squeeze -> (S,)


def reference_forward(hidden, encoder_output, attn_w, attn_b, v_w):
    """Pure-JAX reference matching the PyTorch module."""
    S = encoder_output.shape[0]
    H = hidden.shape[1]
    hidden_rep = jnp.broadcast_to(hidden, (S, H))
    x = jnp.concatenate([hidden_rep, encoder_output], axis=1)
    energy = jnp.tanh(x @ attn_w + attn_b)
    attention = (energy @ v_w)[:, 0]
    return jax.nn.softmax(attention, axis=0)


if __name__ == "__main__":
    H = 32   # hidden_dim
    S = 8    # seq_len

    key = jax.random.PRNGKey(0)
    k_hid, k_enc, k_w, k_b, k_v = jax.random.split(key, 5)

    # deterministic parameter init (uniform +-1/sqrt(fan_in), like nn.Linear)
    bound_attn = 1.0 / jnp.sqrt(3.0 * H)
    bound_v = 1.0 / jnp.sqrt(1.0 * H)
    attn_w = jax.random.uniform(k_w, (3 * H, H), jnp.float32,
                                -bound_attn, bound_attn)
    attn_b = jax.random.uniform(k_b, (H,), jnp.float32,
                                -bound_attn, bound_attn)
    v_w = jax.random.uniform(k_v, (H, 1), jnp.float32, -bound_v, bound_v)

    # inputs
    hidden = jax.random.normal(k_hid, (1, H), jnp.float32)
    encoder_output = jax.random.normal(k_enc, (S, 2 * H), jnp.float32)

    out = attention_forward(hidden, encoder_output, attn_w, attn_b, v_w)
    out = jax.block_until_ready(out)

    ref = reference_forward(hidden, encoder_output, attn_w, attn_b, v_w)
    assert out.shape == (S,)
    # approx reciprocal in the softmax normalizer => slightly relaxed tolerances
    assert jnp.allclose(jnp.sum(out), 1.0, atol=1e-3)
    assert jnp.allclose(out, ref, atol=1e-3, rtol=1e-3), (out, ref)

    print("KERNEL_OK")
</pallas_src>

<mosaic_0001>
module attributes {stable_mosaic.version = 11 : i64} {
  func.func @_attention_kernel(%arg0: memref<1x32xf32, #tpu.memory_space<vmem>>, %arg1: memref<8x64xf32, #tpu.memory_space<vmem>>, %arg2: memref<32x32xf32, #tpu.memory_space<vmem>>, %arg3: memref<64x32xf32, #tpu.memory_space<vmem>>, %arg4: memref<1x32xf32, #tpu.memory_space<vmem>>, %arg5: memref<1x32xf32, #tpu.memory_space<vmem>>, %arg6: memref<1x8xf32, #tpu.memory_space<vmem>>) attributes {dimension_semantics = [], scalar_prefetch = 0 : i64, scratch_operands = 0 : i64, tpu.core_type = #tpu.core_type<tc>} {
    %c0 = arith.constant 0 : index
    %c0_0 = arith.constant 0 : index
    %0 = vector.load %arg0[%c0, %c0_0] : memref<1x32xf32, #tpu.memory_space<vmem>>, vector<1x32xf32>
    %c0_1 = arith.constant 0 : index
    %c0_2 = arith.constant 0 : index
    %1 = vector.load %arg2[%c0_1, %c0_2] : memref<32x32xf32, #tpu.memory_space<vmem>>, vector<32x32xf32>
    %cst = arith.constant dense<0.000000e+00> : vector<1x32xf32>
    %2 = tpu.matmul %0, %1, %cst {dimension_numbers = #tpu.dot_dimension_numbers<[1], [0], [0], [1], [0, 0, 1, 1], [], []>} : vector<1x32xf32>, vector<32x32xf32>, vector<1x32xf32> -> vector<1x32xf32>
    %c0_3 = arith.constant 0 : index
    %c0_4 = arith.constant 0 : index
    %3 = vector.load %arg4[%c0_3, %c0_4] : memref<1x32xf32, #tpu.memory_space<vmem>>, vector<1x32xf32>
    %4 = arith.addf %2, %3 : vector<1x32xf32>
    %c0_5 = arith.constant 0 : index
    %c0_6 = arith.constant 0 : index
    %5 = vector.load %arg1[%c0_5, %c0_6] : memref<8x64xf32, #tpu.memory_space<vmem>>, vector<8x64xf32>
    %c0_7 = arith.constant 0 : index
    %c0_8 = arith.constant 0 : index
    %6 = vector.load %arg3[%c0_7, %c0_8] : memref<64x32xf32, #tpu.memory_space<vmem>>, vector<64x32xf32>
    %cst_9 = arith.constant dense<0.000000e+00> : vector<8x32xf32>
    %7 = tpu.matmul %5, %6, %cst_9 {dimension_numbers = #tpu.dot_dimension_numbers<[1], [0], [0], [1], [0, 0, 1, 1], [], []>} : vector<8x64xf32>, vector<64x32xf32>, vector<8x32xf32> -> vector<8x32xf32>
    %8 = vector.broadcast %4 : vector<1x32xf32> to vector<8x32xf32>
    %9 = arith.addf %7, %8 : vector<8x32xf32>
    %10 = math.tanh %9 : vector<8x32xf32>
    %c0_10 = arith.constant 0 : index
    %c0_11 = arith.constant 0 : index
    %11 = vector.load %arg5[%c0_10, %c0_11] : memref<1x32xf32, #tpu.memory_space<vmem>>, vector<1x32xf32>
    %cst_12 = arith.constant dense<0.000000e+00> : vector<1x8xf32>
    %12 = tpu.matmul %11, %10, %cst_12 {dimension_numbers = #tpu.dot_dimension_numbers<[1], [1], [0], [0], [0, 0, 1, 0], [], []>} : vector<1x32xf32>, vector<8x32xf32>, vector<1x8xf32> -> vector<1x8xf32>
    %cst_13 = arith.constant dense<0xFF800000> : vector<1xf32>
    %13 = vector.multi_reduction <maximumf>, %12, %cst_13 [1] : vector<1x8xf32> to vector<1xf32>
    %14 = vector.shape_cast %13 : vector<1xf32> to vector<1x1xf32>
    %15 = vector.broadcast %14 : vector<1x1xf32> to vector<1x8xf32>
    %16 = arith.subf %12, %15 : vector<1x8xf32>
    %17 = math.exp %16 : vector<1x8xf32>
    %cst_14 = arith.constant dense<0.000000e+00> : vector<1xf32>
    %18 = vector.multi_reduction <add>, %17, %cst_14 [1] : vector<1x8xf32> to vector<1xf32>
    %19 = vector.shape_cast %18 : vector<1xf32> to vector<1x1xf32>
    %20 = tpu.reciprocal %19 {approx = true} : vector<1x1xf32> -> vector<1x1xf32>
    %21 = vector.broadcast %20 : vector<1x1xf32> to vector<1x8xf32>
    %22 = arith.mulf %17, %21 : vector<1x8xf32>
    %c0_15 = arith.constant 0 : index
    %c0_16 = arith.constant 0 : index
    %23 = vector.load %arg6[%c0_15, %c0_16] : memref<1x8xf32, #tpu.memory_space<vmem>>, vector<1x8xf32>
    tpu.vector_store %arg6[%c0_15, %c0_16], %22 {strides = array<i32>} : memref<1x8xf32, #tpu.memory_space<vmem>>, vector<1x8xf32>,
    return
  }
}

</mosaic_0001>

<bundles_post_ra>
// kernel: tpu_custom_call.1
= control target key start
LH: loop header
LB: loop body
LE: loop exit
PB: predicated region body
PF: predicated region fallthrough
CT: control target
= control target key end

     0   :  { %v403_v3 = vmov 0.0|0.0   ;;  %vm404_vm0 = vmmov 0   ;;  %v405_v11 = vmov 0.0   ;;  %s511_s0 = inlined_call_operand.vmem [shape: f32[1,32], index: 0, kind: input, shape index: {}]   ;;  %s512_s1 = inlined_call_operand.vmem [shape: f32[8,64], index: 1, kind: input, shape index: {}]   ;;  %s513_s2 = inlined_call_operand.vmem [shape: f32[32,32], index: 2, kind: input, shape index: {}]   ;;  %s514_s3 = inlined_call_operand.vmem [shape: f32[64,32], index: 3, kind: input, shape index: {}]   ;;  %s515_s4 = inlined_call_operand.vmem [shape: f32[1,32], index: 4, kind: input, shape index: {}]   ;;  %s516_s5 = inlined_call_operand.vmem [shape: f32[1,32], index: 5, kind: input, shape index: {}]   ;;  %s517_s6 = inlined_call_operand.hbm [shape: f32[1,8], index: 6, kind: output, shape index: {}]  }
   0x1   :  { %v105_v0 = vld [vmem:[%s514_s3] sm:$0xff]  ;;  %v106_v1 = vld [vmem:[%s514_s3 + $0x8] sm:$0xff]  ;;  %357 = vmatprep.subr.bf16.mxu1 %v403_v3  ;;  %351 = vmatprep.subr.bf16.mxu0 %v403_v3  ;;  %v107_v6 = vld [vmem:[%s514_s3 + $0x10] sm:$0xff] }
   0x2   :  { %v25_v2 = vld [vmem:[%s513_s2] sm:$0xff]  ;;  %v358_v4 = vpack.c.bf16 %v106_v1, %v105_v0  ;;  %v26_v5 = vld [vmem:[%s513_s2 + $0x8] sm:$0xff]  ;;  %v108_v7 = vld [vmem:[%s514_s3 + $0x18] sm:$0xff]  ;;  %324 = vmatprep.mubr.msk.f32.mxu0 %vm404_vm0, %v405_v11  ;;  %343 = vmatprep.mubr.msk.f32.mxu1 %vm404_vm0, %v405_v11 }
   0x3   :  { %v352_v8 = vpack.c.bf16 %v26_v5, %v25_v2  ;;  %v27_v9 = vld [vmem:[%s513_s2 + $0x10] sm:$0xff]  ;;  %v28_v10 = vld [vmem:[%s513_s2 + $0x18] sm:$0xff]  ;;  %v361_v12 = vpack.c.bf16 %v108_v7, %v107_v6  ;;  %v109_v14 = vld [vmem:[%s514_s3 + $0x20] sm:$0xff] }
   0x4   :  { %359 = vmatpush3.bf16.msra.mxu1 %v358_v4  ;;  %v355_v13 = vpack.c.bf16 %v28_v10, %v27_v9  ;;  %v110_v15 = vld [vmem:[%s514_s3 + $0x28] sm:$0xff] }
   0x5   :  { %353 = vmatpush3.bf16.msra.mxu0 %v352_v8  ;;  %360 = vmatprep.subr.bf16.mxu1 %v403_v3 }
   0x6   :  { %354 = vmatprep.subr.bf16.mxu0 %v403_v3 }
   0x7   :  { %11 = vsyncpa [#allocation3], 0  ;;  %v364_v16 = vpack.c.bf16 %v110_v15, %v109_v14  ;;  %v24_v17 = vld [vmem:[%s511_s0] sm:$0x1]  ;;  %vm30_vm1 = vcmask 261120   ;;  %v111_v18 = vld [vmem:[%s514_s3 + $0x30] sm:$0xff]  ;;  %v113_v22 = vlaneseq }
   0x8   :  { %362 = vmatpush3.bf16.msra.mxu1 %v361_v12  ;;  %v112_v19 = vld [vmem:[%s514_s3 + $0x38] sm:$0xff]  ;;  %v104_v21 = vld [vmem:[%s512_s1] sm:$0xff]  ;;  %vm117_vm2 = vcmask 523264   ;;  %vm269_vm3 = vcmask 57344  }
   0x9   :  { %356 = vmatpush3.bf16.msra.mxu0 %v355_v13  ;;  %363 = vmatprep.subr.bf16.mxu1 %v403_v3  ;;  %v367_v20 = vpack.c.bf16 %v112_v19, %v111_v18  ;;  %v114_v23 = vshrl.u32 %v113_v22, 7  ;;  %v29_v24 = vld [vmem:[%s515_s4] sm:$0x1]  ;;  %s406_s4 = smov [#allocation2]  }
   0xa   :  { %346 = vmatprep.subr.mxu0 %v405_v11  ;;  %v192_v34 = vld [vmem:[%s516_s5] sm:$0x1]  ;;  %s288_s5 = sshll.u32 %s406_s4, 4  ;;  %s289_s5 = int_to_ptr.vmem [resolvable:$true] %s288_s5 }
   0xb   :  { %v115_v26 = vsub.s32 0, %v114_v23  ;;  %s379_s25 = scalar_lea.vmem %s289_s5, 16  ;;  %s383_s26 = scalar_lea.vmem %s289_s5, 32 }
   0xc   :  { %365 = vmatpush3.bf16.msra.mxu1 %v364_v16  ;;  %325 = vmatmul.mubr.msk.f32.vlgmr.msra.gmra.mrb[0].mxu0 %vm30_vm1, %v24_v17  ;;  %p380_p0 = scmp.ne.s32.totalorder %s289_s5, %s379_s25  ;;  %p384_p1 = scmp.lt.s32.totalorder %s289_s5, %s289_s5 }
   0xd   :  { %366 = vmatprep.subr.bf16.mxu1 %v403_v3  ;;  %348 = vmatprep.mubr.msk.f32.mxu0 %vm404_vm0, %v405_v11  ;;  %p385_p2 = scmp.lt.s32.totalorder %s383_s26, %s379_s25 }
   0xf   :  { %p386_p3 = por %p385_p2, %p384_p1 }
  0x10   :  { %368 = vmatpush3.bf16.msra.mxu1 %v367_v20 }
  0x11   :  { %p387_p4 = pnand %p386_p3, %p380_p0 }
  0x13   :  { %344 = vmatmul.mubr.msk.f32.vlgmr.msra.gmra.mrb[0].mxu1 %vm117_vm2, %v104_v21 }
  0xdf   :  { %v100_v25 = vpop.f32.mrb[0].mxu0 }
  0xe0   :  { %v101_v27 = vadd.f32 %v100_v25, %v29_v24  ;;  %v326_v28 = vpop.f32.mrb[1].mxu0 }
  0xe2   :  { %v116_v29 = vrot.slane %v101_v27, %v115_v26 }
  0xe6   :  { %v187_v30 = vpop.f32.mrb[0].mxu1 }
  0xe7   :  { %v188_v31 = vadd.f32 %v187_v30, %v116_v29  ;;  %v345_v32 = vpop.f32.mrb[1].mxu1 }
  0xe9   :  { %373 = vtanh.f32 %v188_v31 }
  0xf3   :  { %v374_v33 = vpop.eup %373 }
  0xf4   :  { %347 = vmatpush3.xpose.msk.msra.mxu0 %vm30_vm1, %v374_v33 }
  0xf7   :  { %349 = vmatmul.mubr.msk.f32.vlgmr.msra.gmra.mrb[2].mxu0 %vm30_vm1, %v192_v34 }
 0x1ca   :  { %v265_v35 = vpop.f32.mrb[2].mxu0 }
 0x1cb   :  { %v350_v36 = vpop.f32.mrb[3].mxu0  ;;  %v270_v37 = vsel %vm269_vm3, %v265_v35, -inf }
 0x1cc   :  { %271 = vmax.xlane.f32.xlu0 %v270_v37 }
 0x259   :  { %v272_v38 = vpop.xlane.xlu0 %271 }
 0x25a   :  { %v273_v39 = vsub.f32 %v265_v35, %v272_v38 }
 0x25c   :  { %v274_v40 = vmul.f32 1.442695, %v273_v39 }
 0x25e   :  { %375 = vpow2.f32 %v274_v40 }
 0x268   :  { %v376_v41 = vpop.eup %375 }
 0x269   :  { %v276_v42 = vsel %vm269_vm3, %v376_v41, 0.0 }
 0x26a   :  { %277 = vadd.xlane.f32.xlu0 %v276_v42 }
 0x2f7   :  { %v278_v43 = vpop.xlane.xlu0 %277 }
 0x2f8   :  { %377 = vrcp.f32 %v278_v43 }
 0x302   :  { %v378_v44 = vpop.eup %377 }
 0x303   :  { %v280_v45 = vmul.f32 %v378_v44, %v376_v41 }
 0x305   :  { %281 = vst.msk [vmem:[#allocation2] sm:$0x1] %vm269_vm3, %v280_v45 }
 0x306   :  { %390 = shalt.err (!%p387_p4)
}
 0x307   :  { %s391_s29 = scalar_lea.hbm %s517_s6, 16 }
 0x308   :  { %p392_p5 = scmp.ne.s32.totalorder %s517_s6, %s391_s29  ;;  %p395_p6 = scmp.lt.u32.totalorder %s391_s29, %s517_s6 }
 0x30a   :  { %p397_p7 = pnand %p395_p6, %p392_p5 }
 0x30c   :  { %400 = shalt.err (!%p397_p7)
}
 0x30d   :  { %291 = dma.vmem_to_hbm [thread:$0]  %s289_s5, 16, %s517_s6, [#allocation3]  }
 0x30e   :  { %401 = dma.done.wait [#allocation3], 16  }
 0x30f   :  { %402 = vsyncadd [#allocation3], 4294967280 }
 0x310   :  { %295 = vsyncpa [#allocation3], 1 }

</bundles_post_ra>
